<compile_context>
chip_gen: v6e
topology: v6e:2x2x1
jax: 0.10.0
libtpu: 0.0.40
codegen_flags: <defaults>
</compile_context>

<pallas_src>
import functools

import numpy as np
import jax
import jax.numpy as jnp
from jax.experimental import pallas as pl
from jax.experimental.pallas import tpu as pltpu


_VMEM_SPEC = pl.BlockSpec(memory_space=pltpu.MemorySpace.VMEM)


# ----------------------------------------------------------------------------
# Fused kernel: distances -> k-smallest selection -> neighbor gather -> MLP
# ----------------------------------------------------------------------------
def _fused_prior_kernel(
    chosen_ref,          # (B, 1) int32 : which of the k nearest neighbors to take
    x_ref,               # (B, C)       : query codes
    codes_ref,           # (N, C)       : codebook
    c2_ref,              # (1, N)       : precomputed ||codes||^2
    w_in, b_in,          # input_layer
    w_h1, b_h1,          # h1
    w_skip, b_skip,      # concat[skipin_to_2 | skipin_to_3 | skip1_to_out]  (H, 3H)
    w_h2, b_h2,          # h2
    w_s2o, b_s2o,        # skip2_to_out
    w_h3, b_h3,          # h3
    w_head, b_head,      # concat[fc_mu | fc_s]                              (H, 2C)
    out_ref,             # (B, 2C)      : [mu | logstd]
    *,
    k: int,
):
    x = x_ref[...]                      # (B, C)
    codes = codes_ref[...]              # (N, C)
    c2 = c2_ref[...]                    # (1, N)

    # ---- distances (||x||^2 dropped: constant per row, ranking-invariant) ----
    xc = jax.lax.dot_general(
        x, codes, (((1,), (1,)), ((), ())), preferred_element_type=jnp.float32
    )                                   # (B, N) == x @ codes.T
    d = -2.0 * xc + c2                  # (B, N)

    B, N = d.shape
    lane_idx = jax.lax.broadcasted_iota(jnp.int32, (B, N), 1)
    chosen = chosen_ref[...]            # (B, 1) int32

    # ---- iterative k-smallest selection (argmin-with-first-tie via min reductions) ----
    sel = jnp.zeros((B, N), jnp.float32)
    for step in range(k):               # k is small & static -> unrolled
        row_min = jnp.min(d, axis=1, keepdims=True)                       # (B, 1)
        is_min = d == row_min                                             # (B, N)
        first_idx = jnp.min(
            jnp.where(is_min, lane_idx, N), axis=1, keepdims=True
        )                                                                 # (B, 1)
        onehot = lane_idx == first_idx                                    # (B, N)
        take = jnp.logical_and(onehot, chosen == step)
        sel = jnp.where(take, 1.0, sel)
        d = jnp.where(onehot, jnp.inf, d)                                 # mask out found

    # ---- gather chosen neighbor rows via one-hot matmul (MXU, no dynamic gather) ----
    prev = jax.lax.dot_general(
        sel, codes, (((1,), (0,)), ((), ())), preferred_element_type=jnp.float32
    )                                   # (B, C)

    # ---- skip-connected 3-hidden-layer tanh MLP ----
    def lin(a, w, b):
        return jnp.dot(a, w[...], preferred_element_type=jnp.float32) + b[...]

    H = w_h1.shape[0]
    i = jnp.tanh(lin(prev, w_in, b_in))                 # input_layer
    h1 = jnp.tanh(lin(i, w_h1, b_h1))                   # h1
    skipcat = jnp.tanh(lin(h1, w_skip, b_skip))         # (B, 3H) merged skips
    s2 = skipcat[:, 0:H]                                # skipin_to_2
    s3 = skipcat[:, H:2 * H]                            # skipin_to_3
    o1 = skipcat[:, 2 * H:3 * H]                        # skip1_to_out
    h2 = jnp.tanh(lin(h1 + s2, w_h2, b_h2))             # h2
    o2 = jnp.tanh(lin(h2, w_s2o, b_s2o))                # skip2_to_out
    o3 = jnp.tanh(lin(h2 + s3, w_h3, b_h3))             # h3
    out = o1 + o2 + o3
    out_ref[...] = lin(out, w_head, b_head)             # [mu | logstd]  (B, 2C)


# ----------------------------------------------------------------------------
# Wrapper
# ----------------------------------------------------------------------------
def prior_network_forward(codes_in, params, codes_table, k, chosen_neighbor_index):
    """Replicates PriorNetwork.forward (training mode: random neighbor choice)."""
    B, C = codes_in.shape
    N = codes_table.shape[0]

    # Precompute / merge weights outside the kernel (cheap, static across calls).
    c2 = jnp.sum(codes_table * codes_table, axis=1)[None, :]              # (1, N)
    w_skip = jnp.concatenate(
        [params["skipin_to_2"][0], params["skipin_to_3"][0], params["skip1_to_out"][0]],
        axis=1,
    )
    b_skip = jnp.concatenate(
        [params["skipin_to_2"][1], params["skipin_to_3"][1], params["skip1_to_out"][1]],
        axis=1,
    )
    w_head = jnp.concatenate([params["fc_mu"][0], params["fc_s"][0]], axis=1)
    b_head = jnp.concatenate([params["fc_mu"][1], params["fc_s"][1]], axis=1)
    chosen = chosen_neighbor_index.astype(jnp.int32).reshape(B, 1)

    inputs = (
        chosen, codes_in, codes_table, c2,
        params["input_layer"][0], params["input_layer"][1],
        params["h1"][0], params["h1"][1],
        w_skip, b_skip,
        params["h2"][0], params["h2"][1],
        params["skip2_to_out"][0], params["skip2_to_out"][1],
        params["h3"][0], params["h3"][1],
        w_head, b_head,
    )

    out = pl.pallas_call(
        functools.partial(_fused_prior_kernel, k=k),
        out_shape=jax.ShapeDtypeStruct((B, 2 * C), jnp.float32),
        in_specs=[_VMEM_SPEC] * len(inputs),
        out_specs=_VMEM_SPEC,
    )(*inputs)

    return out[:, :C], out[:, C:]


# ----------------------------------------------------------------------------
# Deterministic parameter init (shapes from PriorNetwork.__init__)
# ----------------------------------------------------------------------------
def init_params(key, code_length, n_hidden):
    layer_dims = {
        "input_layer":  (code_length, n_hidden),
        "skipin_to_2":  (n_hidden, n_hidden),
        "skipin_to_3":  (n_hidden, n_hidden),
        "skip1_to_out": (n_hidden, n_hidden),
        "skip2_to_out": (n_hidden, n_hidden),
        "h1":           (n_hidden, n_hidden),
        "h2":           (n_hidden, n_hidden),
        "h3":           (n_hidden, n_hidden),
        "fc_mu":        (n_hidden, code_length),
        "fc_s":         (n_hidden, code_length),
    }
    params = {}
    for name, (fan_in, fan_out) in layer_dims.items():
        key, kw, kb = jax.random.split(key, 3)
        bound = 1.0 / np.sqrt(fan_in)
        w = jax.random.uniform(kw, (fan_in, fan_out), jnp.float32, -bound, bound)
        b = jax.random.uniform(kb, (1, fan_out), jnp.float32, -bound, bound)
        params[name] = (w, b)
    return params


# ----------------------------------------------------------------------------
# Pure-JAX reference for a correctness check (mirrors the PyTorch module)
# ----------------------------------------------------------------------------
def reference_forward(codes_in, params, codes_table, k, chosen):
    t2 = jnp.sum(codes_in ** 2, axis=1, keepdims=True)
    c2 = jnp.sum(codes_table ** 2, axis=1, keepdims=True)
    dists = -2.0 * codes_in @ codes_table.T + t2 + c2.T
    _, nbr = jax.lax.top_k(-dists, k)
    prev = codes_table[nbr[jnp.arange(codes_in.shape[0]), chosen]]

    def lin(x, name):
        w, b = params[name]
        return x @ w + b

    i = jnp.tanh(lin(prev, "input_layer"))
    h1 = jnp.tanh(lin(i, "h1"))
    s2 = jnp.tanh(lin(h1, "skipin_to_2"))
    s3 = jnp.tanh(lin(h1, "skipin_to_3"))
    h2 = jnp.tanh(lin(h1 + s2, "h2"))
    o1 = jnp.tanh(lin(h1, "skip1_to_out"))
    o2 = jnp.tanh(lin(h2, "skip2_to_out"))
    o3 = jnp.tanh(lin(h2 + s3, "h3"))
    out = o1 + o2 + o3
    return lin(out, "fc_mu"), lin(out, "fc_s")


# ----------------------------------------------------------------------------
if __name__ == "__main__":
    # Small, module-consistent shapes
    code_length = 16
    n_hidden = 64
    size_training_set = 128
    k = 5
    batch = 8
    random_seed = 4543

    # Replicate the module's numpy RNG stream: codes table first, then the
    # training-mode random neighbor choice (rdn.randint(0, k, size=bsize)).
    # TODO(synk): the np.random.RandomState draw has no Pallas equivalent; it is
    # reproduced host-side exactly as the module does.
    rdn = np.random.RandomState(random_seed)
    codes_table = jnp.asarray(
        rdn.standard_normal((size_training_set, code_length)), dtype=jnp.float32
    )
    chosen_neighbor_index = jnp.asarray(
        rdn.randint(0, k, size=batch), dtype=jnp.int32
    )

    key = jax.random.PRNGKey(0)
    key, pkey, xkey = jax.random.split(key, 3)
    params = init_params(pkey, code_length, n_hidden)

    codes_in = jax.random.normal(xkey, (batch, code_length), dtype=jnp.float32)

    mu, logstd = prior_network_forward(
        codes_in, params, codes_table, k, chosen_neighbor_index
    )
    jax.block_until_ready((mu, logstd))

    mu_ref, logstd_ref = reference_forward(
        codes_in, params, codes_table, k, chosen_neighbor_index
    )
    np.testing.assert_allclose(np.asarray(mu), np.asarray(mu_ref), atol=1e-5, rtol=1e-5)
    np.testing.assert_allclose(
        np.asarray(logstd), np.asarray(logstd_ref), atol=1e-5, rtol=1e-5
    )

    print("KERNEL_OK")
</pallas_src>

<mosaic_0001>
module attributes {stable_mosaic.version = 11 : i64} {
  func.func @_fused_prior_kernel(%arg0: memref<8x1xi32, #tpu.memory_space<vmem>>, %arg1: memref<8x16xf32, #tpu.memory_space<vmem>>, %arg2: memref<128x16xf32, #tpu.memory_space<vmem>>, %arg3: memref<1x128xf32, #tpu.memory_space<vmem>>, %arg4: memref<16x64xf32, #tpu.memory_space<vmem>>, %arg5: memref<1x64xf32, #tpu.memory_space<vmem>>, %arg6: memref<64x64xf32, #tpu.memory_space<vmem>>, %arg7: memref<1x64xf32, #tpu.memory_space<vmem>>, %arg8: memref<64x192xf32, #tpu.memory_space<vmem>>, %arg9: memref<1x192xf32, #tpu.memory_space<vmem>>, %arg10: memref<64x64xf32, #tpu.memory_space<vmem>>, %arg11: memref<1x64xf32, #tpu.memory_space<vmem>>, %arg12: memref<64x64xf32, #tpu.memory_space<vmem>>, %arg13: memref<1x64xf32, #tpu.memory_space<vmem>>, %arg14: memref<64x64xf32, #tpu.memory_space<vmem>>, %arg15: memref<1x64xf32, #tpu.memory_space<vmem>>, %arg16: memref<64x32xf32, #tpu.memory_space<vmem>>, %arg17: memref<1x32xf32, #tpu.memory_space<vmem>>, %arg18: memref<8x32xf32, #tpu.memory_space<vmem>>) attributes {dimension_semantics = [], scalar_prefetch = 0 : i64, scratch_operands = 0 : i64, tpu.core_type = #tpu.core_type<tc>} {
    %c0 = arith.constant 0 : index
    %c0_0 = arith.constant 0 : index
    %0 = vector.load %arg1[%c0, %c0_0] : memref<8x16xf32, #tpu.memory_space<vmem>>, vector<8x16xf32>
    %c0_1 = arith.constant 0 : index
    %c0_2 = arith.constant 0 : index
    %1 = vector.load %arg2[%c0_1, %c0_2] : memref<128x16xf32, #tpu.memory_space<vmem>>, vector<128x16xf32>
    %c0_3 = arith.constant 0 : index
    %c0_4 = arith.constant 0 : index
    %2 = vector.load %arg3[%c0_3, %c0_4] : memref<1x128xf32, #tpu.memory_space<vmem>>, vector<1x128xf32>
    %cst = arith.constant dense<0.000000e+00> : vector<8x128xf32>
    %3 = tpu.matmul %0, %1, %cst {dimension_numbers = #tpu.dot_dimension_numbers<[1], [1], [0], [0], [0, 0, 1, 0], [], []>} : vector<8x16xf32>, vector<128x16xf32>, vector<8x128xf32> -> vector<8x128xf32>
    %cst_5 = arith.constant -2.000000e+00 : f32
    %4 = vector.broadcast %cst_5 : f32 to vector<8x128xf32>
    %5 = arith.mulf %4, %3 : vector<8x128xf32>
    %6 = vector.broadcast %2 : vector<1x128xf32> to vector<8x128xf32>
    %7 = arith.addf %5, %6 : vector<8x128xf32>
    %8 = tpu.iota {dimensions = array<i32: 1>} : vector<8x128xi32>
    %c0_6 = arith.constant 0 : index
    %c0_7 = arith.constant 0 : index
    %9 = vector.load %arg0[%c0_6, %c0_7] : memref<8x1xi32, #tpu.memory_space<vmem>>, vector<8x1xi32>
    %cst_8 = arith.constant 0.000000e+00 : f32
    %10 = vector.broadcast %cst_8 : f32 to vector<8x128xf32>
    %cst_9 = arith.constant dense<0x7F800000> : vector<8xf32>
    %11 = vector.multi_reduction <minimumf>, %7, %cst_9 [1] : vector<8x128xf32> to vector<8xf32>
    %12 = vector.shape_cast %11 : vector<8xf32> to vector<8x1xf32>
    %13 = vector.broadcast %12 : vector<8x1xf32> to vector<8x128xf32>
    %14 = arith.cmpf oeq, %7, %13 : vector<8x128xf32>
    %c128_i32 = arith.constant 128 : i32
    %15 = vector.broadcast %c128_i32 : i32 to vector<8x128xi32>
    %16 = arith.select %14, %8, %15 : vector<8x128xi1>, vector<8x128xi32>
    %cst_10 = arith.constant dense<2147483647> : vector<8xi32>
    %17 = vector.multi_reduction <minsi>, %16, %cst_10 [1] : vector<8x128xi32> to vector<8xi32>
    %18 = vector.shape_cast %17 : vector<8xi32> to vector<8x1xi32>
    %19 = vector.broadcast %18 : vector<8x1xi32> to vector<8x128xi32>
    %20 = arith.cmpi eq, %8, %19 : vector<8x128xi32>
    %c0_i32 = arith.constant 0 : i32
    %21 = vector.broadcast %c0_i32 : i32 to vector<8x1xi32>
    %22 = arith.cmpi eq, %9, %21 : vector<8x1xi32>
    %23 = vector.broadcast %22 : vector<8x1xi1> to vector<8x128xi1>
    %24 = arith.andi %20, %23 : vector<8x128xi1>
    %cst_11 = arith.constant 1.000000e+00 : f32
    %25 = vector.broadcast %cst_11 : f32 to vector<8x128xf32>
    %26 = arith.select %24, %25, %10 : vector<8x128xi1>, vector<8x128xf32>
    %cst_12 = arith.constant 0x7F800000 : f32
    %27 = vector.broadcast %cst_12 : f32 to vector<8x128xf32>
    %28 = arith.select %20, %27, %7 : vector<8x128xi1>, vector<8x128xf32>
    %cst_13 = arith.constant dense<0x7F800000> : vector<8xf32>
    %29 = vector.multi_reduction <minimumf>, %28, %cst_13 [1] : vector<8x128xf32> to vector<8xf32>
    %30 = vector.shape_cast %29 : vector<8xf32> to vector<8x1xf32>
    %31 = vector.broadcast %30 : vector<8x1xf32> to vector<8x128xf32>
    %32 = arith.cmpf oeq, %28, %31 : vector<8x128xf32>
    %c128_i32_14 = arith.constant 128 : i32
    %33 = vector.broadcast %c128_i32_14 : i32 to vector<8x128xi32>
    %34 = arith.select %32, %8, %33 : vector<8x128xi1>, vector<8x128xi32>
    %cst_15 = arith.constant dense<2147483647> : vector<8xi32>
    %35 = vector.multi_reduction <minsi>, %34, %cst_15 [1] : vector<8x128xi32> to vector<8xi32>
    %36 = vector.shape_cast %35 : vector<8xi32> to vector<8x1xi32>
    %37 = vector.broadcast %36 : vector<8x1xi32> to vector<8x128xi32>
    %38 = arith.cmpi eq, %8, %37 : vector<8x128xi32>
    %c1_i32 = arith.constant 1 : i32
    %39 = vector.broadcast %c1_i32 : i32 to vector<8x1xi32>
    %40 = arith.cmpi eq, %9, %39 : vector<8x1xi32>
    %41 = vector.broadcast %40 : vector<8x1xi1> to vector<8x128xi1>
    %42 = arith.andi %38, %41 : vector<8x128xi1>
    %cst_16 = arith.constant 1.000000e+00 : f32
    %43 = vector.broadcast %cst_16 : f32 to vector<8x128xf32>
    %44 = arith.select %42, %43, %26 : vector<8x128xi1>, vector<8x128xf32>
    %cst_17 = arith.constant 0x7F800000 : f32
    %45 = vector.broadcast %cst_17 : f32 to vector<8x128xf32>
    %46 = arith.select %38, %45, %28 : vector<8x128xi1>, vector<8x128xf32>
    %cst_18 = arith.constant dense<0x7F800000> : vector<8xf32>
    %47 = vector.multi_reduction <minimumf>, %46, %cst_18 [1] : vector<8x128xf32> to vector<8xf32>
    %48 = vector.shape_cast %47 : vector<8xf32> to vector<8x1xf32>
    %49 = vector.broadcast %48 : vector<8x1xf32> to vector<8x128xf32>
    %50 = arith.cmpf oeq, %46, %49 : vector<8x128xf32>
    %c128_i32_19 = arith.constant 128 : i32
    %51 = vector.broadcast %c128_i32_19 : i32 to vector<8x128xi32>
    %52 = arith.select %50, %8, %51 : vector<8x128xi1>, vector<8x128xi32>
    %cst_20 = arith.constant dense<2147483647> : vector<8xi32>
    %53 = vector.multi_reduction <minsi>, %52, %cst_20 [1] : vector<8x128xi32> to vector<8xi32>
    %54 = vector.shape_cast %53 : vector<8xi32> to vector<8x1xi32>
    %55 = vector.broadcast %54 : vector<8x1xi32> to vector<8x128xi32>
    %56 = arith.cmpi eq, %8, %55 : vector<8x128xi32>
    %c2_i32 = arith.constant 2 : i32
    %57 = vector.broadcast %c2_i32 : i32 to vector<8x1xi32>
    %58 = arith.cmpi eq, %9, %57 : vector<8x1xi32>
    %59 = vector.broadcast %58 : vector<8x1xi1> to vector<8x128xi1>
    %60 = arith.andi %56, %59 : vector<8x128xi1>
    %cst_21 = arith.constant 1.000000e+00 : f32
    %61 = vector.broadcast %cst_21 : f32 to vector<8x128xf32>
    %62 = arith.select %60, %61, %44 : vector<8x128xi1>, vector<8x128xf32>
    %cst_22 = arith.constant 0x7F800000 : f32
    %63 = vector.broadcast %cst_22 : f32 to vector<8x128xf32>
    %64 = arith.select %56, %63, %46 : vector<8x128xi1>, vector<8x128xf32>
    %cst_23 = arith.constant dense<0x7F800000> : vector<8xf32>
    %65 = vector.multi_reduction <minimumf>, %64, %cst_23 [1] : vector<8x128xf32> to vector<8xf32>
    %66 = vector.shape_cast %65 : vector<8xf32> to vector<8x1xf32>
    %67 = vector.broadcast %66 : vector<8x1xf32> to vector<8x128xf32>
    %68 = arith.cmpf oeq, %64, %67 : vector<8x128xf32>
    %c128_i32_24 = arith.constant 128 : i32
    %69 = vector.broadcast %c128_i32_24 : i32 to vector<8x128xi32>
    %70 = arith.select %68, %8, %69 : vector<8x128xi1>, vector<8x128xi32>
    %cst_25 = arith.constant dense<2147483647> : vector<8xi32>
    %71 = vector.multi_reduction <minsi>, %70, %cst_25 [1] : vector<8x128xi32> to vector<8xi32>
    %72 = vector.shape_cast %71 : vector<8xi32> to vector<8x1xi32>
    %73 = vector.broadcast %72 : vector<8x1xi32> to vector<8x128xi32>
    %74 = arith.cmpi eq, %8, %73 : vector<8x128xi32>
    %c3_i32 = arith.constant 3 : i32
    %75 = vector.broadcast %c3_i32 : i32 to vector<8x1xi32>
    %76 = arith.cmpi eq, %9, %75 : vector<8x1xi32>
    %77 = vector.broadcast %76 : vector<8x1xi1> to vector<8x128xi1>
    %78 = arith.andi %74, %77 : vector<8x128xi1>
    %cst_26 = arith.constant 1.000000e+00 : f32
    %79 = vector.broadcast %cst_26 : f32 to vector<8x128xf32>
    %80 = arith.select %78, %79, %62 : vector<8x128xi1>, vector<8x128xf32>
    %cst_27 = arith.constant 0x7F800000 : f32
    %81 = vector.broadcast %cst_27 : f32 to vector<8x128xf32>
    %82 = arith.select %74, %81, %64 : vector<8x128xi1>, vector<8x128xf32>
    %cst_28 = arith.constant dense<0x7F800000> : vector<8xf32>
    %83 = vector.multi_reduction <minimumf>, %82, %cst_28 [1] : vector<8x128xf32> to vector<8xf32>
    %84 = vector.shape_cast %83 : vector<8xf32> to vector<8x1xf32>
    %85 = vector.broadcast %84 : vector<8x1xf32> to vector<8x128xf32>
    %86 = arith.cmpf oeq, %82, %85 : vector<8x128xf32>
    %c128_i32_29 = arith.constant 128 : i32
    %87 = vector.broadcast %c128_i32_29 : i32 to vector<8x128xi32>
    %88 = arith.select %86, %8, %87 : vector<8x128xi1>, vector<8x128xi32>
    %cst_30 = arith.constant dense<2147483647> : vector<8xi32>
    %89 = vector.multi_reduction <minsi>, %88, %cst_30 [1] : vector<8x128xi32> to vector<8xi32>
    %90 = vector.shape_cast %89 : vector<8xi32> to vector<8x1xi32>
    %91 = vector.broadcast %90 : vector<8x1xi32> to vector<8x128xi32>
    %92 = arith.cmpi eq, %8, %91 : vector<8x128xi32>
    %c4_i32 = arith.constant 4 : i32
    %93 = vector.broadcast %c4_i32 : i32 to vector<8x1xi32>
    %94 = arith.cmpi eq, %9, %93 : vector<8x1xi32>
    %95 = vector.broadcast %94 : vector<8x1xi1> to vector<8x128xi1>
    %96 = arith.andi %92, %95 : vector<8x128xi1>
    %cst_31 = arith.constant 1.000000e+00 : f32
    %97 = vector.broadcast %cst_31 : f32 to vector<8x128xf32>
    %98 = arith.select %96, %97, %80 : vector<8x128xi1>, vector<8x128xf32>
    %cst_32 = arith.constant dense<0.000000e+00> : vector<8x16xf32>
    %99 = tpu.matmul %98, %1, %cst_32 {dimension_numbers = #tpu.dot_dimension_numbers<[1], [0], [0], [1], [0, 0, 1, 1], [], []>} : vector<8x128xf32>, vector<128x16xf32>, vector<8x16xf32> -> vector<8x16xf32>
    %c0_33 = arith.constant 0 : index
    %c0_34 = arith.constant 0 : index
    %100 = vector.load %arg4[%c0_33, %c0_34] : memref<16x64xf32, #tpu.memory_space<vmem>>, vector<16x64xf32>
    %cst_35 = arith.constant dense<0.000000e+00> : vector<8x64xf32>
    %101 = tpu.matmul %99, %100, %cst_35 {dimension_numbers = #tpu.dot_dimension_numbers<[1], [0], [0], [1], [0, 0, 1, 1], [], []>} : vector<8x16xf32>, vector<16x64xf32>, vector<8x64xf32> -> vector<8x64xf32>
    %c0_36 = arith.constant 0 : index
    %c0_37 = arith.constant 0 : index
    %102 = vector.load %arg5[%c0_36, %c0_37] : memref<1x64xf32, #tpu.memory_space<vmem>>, vector<1x64xf32>
    %103 = vector.broadcast %102 : vector<1x64xf32> to vector<8x64xf32>
    %104 = arith.addf %101, %103 : vector<8x64xf32>
    %105 = math.tanh %104 : vector<8x64xf32>
    %c0_38 = arith.constant 0 : index
    %c0_39 = arith.constant 0 : index
    %106 = vector.load %arg6[%c0_38, %c0_39] : memref<64x64xf32, #tpu.memory_space<vmem>>, vector<64x64xf32>
    %cst_40 = arith.constant dense<0.000000e+00> : vector<8x64xf32>
    %107 = tpu.matmul %105, %106, %cst_40 {dimension_numbers = #tpu.dot_dimension_numbers<[1], [0], [0], [1], [0, 0, 1, 1], [], []>} : vector<8x64xf32>, vector<64x64xf32>, vector<8x64xf32> -> vector<8x64xf32>
    %c0_41 = arith.constant 0 : index
    %c0_42 = arith.constant 0 : index
    %108 = vector.load %arg7[%c0_41, %c0_42] : memref<1x64xf32, #tpu.memory_space<vmem>>, vector<1x64xf32>
    %109 = vector.broadcast %108 : vector<1x64xf32> to vector<8x64xf32>
    %110 = arith.addf %107, %109 : vector<8x64xf32>
    %111 = math.tanh %110 : vector<8x64xf32>
    %c0_43 = arith.constant 0 : index
    %c0_44 = arith.constant 0 : index
    %112 = vector.load %arg8[%c0_43, %c0_44] : memref<64x192xf32, #tpu.memory_space<vmem>>, vector<64x192xf32>
    %cst_45 = arith.constant dense<0.000000e+00> : vector<8x192xf32>
    %113 = tpu.matmul %111, %112, %cst_45 {dimension_numbers = #tpu.dot_dimension_numbers<[1], [0], [0], [1], [0, 0, 1, 1], [], []>} : vector<8x64xf32>, vector<64x192xf32>, vector<8x192xf32> -> vector<8x192xf32>
    %c0_46 = arith.constant 0 : index
    %c0_47 = arith.constant 0 : index
    %114 = vector.load %arg9[%c0_46, %c0_47] : memref<1x192xf32, #tpu.memory_space<vmem>>, vector<1x192xf32>
    %115 = vector.broadcast %114 : vector<1x192xf32> to vector<8x192xf32>
    %116 = arith.addf %113, %115 : vector<8x192xf32>
    %117 = math.tanh %116 : vector<8x192xf32>
    %118 = vector.extract_strided_slice %117 {offsets = [0, 0], sizes = [8, 64], strides = [1, 1]} : vector<8x192xf32> to vector<8x64xf32>
    %119 = vector.extract_strided_slice %117 {offsets = [0, 64], sizes = [8, 64], strides = [1, 1]} : vector<8x192xf32> to vector<8x64xf32>
    %120 = vector.extract_strided_slice %117 {offsets = [0, 128], sizes = [8, 64], strides = [1, 1]} : vector<8x192xf32> to vector<8x64xf32>
    %121 = arith.addf %111, %118 : vector<8x64xf32>
    %c0_48 = arith.constant 0 : index
    %c0_49 = arith.constant 0 : index
    %122 = vector.load %arg10[%c0_48, %c0_49] : memref<64x64xf32, #tpu.memory_space<vmem>>, vector<64x64xf32>
    %cst_50 = arith.constant dense<0.000000e+00> : vector<8x64xf32>
    %123 = tpu.matmul %121, %122, %cst_50 {dimension_numbers = #tpu.dot_dimension_numbers<[1], [0], [0], [1], [0, 0, 1, 1], [], []>} : vector<8x64xf32>, vector<64x64xf32>, vector<8x64xf32> -> vector<8x64xf32>
    %c0_51 = arith.constant 0 : index
    %c0_52 = arith.constant 0 : index
    %124 = vector.load %arg11[%c0_51, %c0_52] : memref<1x64xf32, #tpu.memory_space<vmem>>, vector<1x64xf32>
    %125 = vector.broadcast %124 : vector<1x64xf32> to vector<8x64xf32>
    %126 = arith.addf %123, %125 : vector<8x64xf32>
    %127 = math.tanh %126 : vector<8x64xf32>
    %c0_53 = arith.constant 0 : index
    %c0_54 = arith.constant 0 : index
    %128 = vector.load %arg12[%c0_53, %c0_54] : memref<64x64xf32, #tpu.memory_space<vmem>>, vector<64x64xf32>
    %cst_55 = arith.constant dense<0.000000e+00> : vector<8x64xf32>
    %129 = tpu.matmul %127, %128, %cst_55 {dimension_numbers = #tpu.dot_dimension_numbers<[1], [0], [0], [1], [0, 0, 1, 1], [], []>} : vector<8x64xf32>, vector<64x64xf32>, vector<8x64xf32> -> vector<8x64xf32>
    %c0_56 = arith.constant 0 : index
    %c0_57 = arith.constant 0 : index
    %130 = vector.load %arg13[%c0_56, %c0_57] : memref<1x64xf32, #tpu.memory_space<vmem>>, vector<1x64xf32>
    %131 = vector.broadcast %130 : vector<1x64xf32> to vector<8x64xf32>
    %132 = arith.addf %129, %131 : vector<8x64xf32>
    %133 = math.tanh %132 : vector<8x64xf32>
    %134 = arith.addf %127, %119 : vector<8x64xf32>
    %c0_58 = arith.constant 0 : index
    %c0_59 = arith.constant 0 : index
    %135 = vector.load %arg14[%c0_58, %c0_59] : memref<64x64xf32, #tpu.memory_space<vmem>>, vector<64x64xf32>
    %cst_60 = arith.constant dense<0.000000e+00> : vector<8x64xf32>
    %136 = tpu.matmul %134, %135, %cst_60 {dimension_numbers = #tpu.dot_dimension_numbers<[1], [0], [0], [1], [0, 0, 1, 1], [], []>} : vector<8x64xf32>, vector<64x64xf32>, vector<8x64xf32> -> vector<8x64xf32>
    %c0_61 = arith.constant 0 : index
    %c0_62 = arith.constant 0 : index
    %137 = vector.load %arg15[%c0_61, %c0_62] : memref<1x64xf32, #tpu.memory_space<vmem>>, vector<1x64xf32>
    %138 = vector.broadcast %137 : vector<1x64xf32> to vector<8x64xf32>
    %139 = arith.addf %136, %138 : vector<8x64xf32>
    %140 = math.tanh %139 : vector<8x64xf32>
    %141 = arith.addf %120, %133 : vector<8x64xf32>
    %142 = arith.addf %141, %140 : vector<8x64xf32>
    %c0_63 = arith.constant 0 : index
    %c0_64 = arith.constant 0 : index
    %143 = vector.load %arg16[%c0_63, %c0_64] : memref<64x32xf32, #tpu.memory_space<vmem>>, vector<64x32xf32>
    %cst_65 = arith.constant dense<0.000000e+00> : vector<8x32xf32>
    %144 = tpu.matmul %142, %143, %cst_65 {dimension_numbers = #tpu.dot_dimension_numbers<[1], [0], [0], [1], [0, 0, 1, 1], [], []>} : vector<8x64xf32>, vector<64x32xf32>, vector<8x32xf32> -> vector<8x32xf32>
    %c0_66 = arith.constant 0 : index
    %c0_67 = arith.constant 0 : index
    %145 = vector.load %arg17[%c0_66, %c0_67] : memref<1x32xf32, #tpu.memory_space<vmem>>, vector<1x32xf32>
    %146 = vector.broadcast %145 : vector<1x32xf32> to vector<8x32xf32>
    %147 = arith.addf %144, %146 : vector<8x32xf32>
    %c0_68 = arith.constant 0 : index
    %c0_69 = arith.constant 0 : index
    %148 = vector.load %arg18[%c0_68, %c0_69] : memref<8x32xf32, #tpu.memory_space<vmem>>, vector<8x32xf32>
    tpu.vector_store %arg18[%c0_68, %c0_69], %147 {strides = array<i32>} : memref<8x32xf32, #tpu.memory_space<vmem>>, vector<8x32xf32>,
    return
  }
}

</mosaic_0001>

<bundles_post_ra>
// kernel: tpu_custom_call.1
= control target key start
LH: loop header
LB: loop body
LE: loop exit
PB: predicated region body
PF: predicated region fallthrough
CT: control target
= control target key end

     0   :  { %s2107_s0 = inlined_call_operand.vmem [shape: s32[8,1], index: 0, kind: input, shape index: {}]   ;;  %s2108_s1 = inlined_call_operand.hbm [shape: f32[8,16], index: 1, kind: input, shape index: {}]   ;;  %s2109_s2 = inlined_call_operand.vmem [shape: f32[128,16], index: 2, kind: input, shape index: {}]   ;;  %s2110_s3 = inlined_call_operand.hbm [shape: f32[1,128], index: 3, kind: input, shape index: {}]   ;;  %s2111_s4 = inlined_call_operand.hbm [shape: f32[16,64], index: 4, kind: input, shape index: {}]   ;;  %s2112_s5 = inlined_call_operand.hbm [shape: f32[1,64], index: 5, kind: input, shape index: {}]   ;;  %s2113_s6 = inlined_call_operand.vmem [shape: f32[64,64], index: 6, kind: input, shape index: {}]   ;;  %s2114_s7 = inlined_call_operand.vmem [shape: f32[1,64], index: 7, kind: input, shape index: {}]   ;;  %s2115_s8 = inlined_call_operand.vmem [shape: f32[64,192], index: 8, kind: input, shape index: {}]   ;;  %s2116_s9 = inlined_call_operand.vmem [shape: f32[1,192], index: 9, kind: input, shape index: {}]   ;;  %s2117_s10 = inlined_call_operand.vmem [shape: f32[64,64], index: 10, kind: input, shape index: {}]   ;;  %s2118_s11 = inlined_call_operand.vmem [shape: f32[1,64], index: 11, kind: input, shape index: {}]   ;;  %s2119_s12 = inlined_call_operand.hbm [shape: f32[64,64], index: 12, kind: input, shape index: {}]   ;;  %s2120_s13 = inlined_call_operand.vmem [shape: f32[1,64], index: 13, kind: input, shape index: {}]   ;;  %s2121_s14 = inlined_call_operand.hbm [shape: f32[64,64], index: 14, kind: input, shape index: {}]   ;;  %s2122_s15 = inlined_call_operand.vmem [shape: f32[1,64], index: 15, kind: input, shape index: {}]   ;;  %s2123_s16 = inlined_call_operand.vmem [shape: f32[64,32], index: 16, kind: input, shape index: {}]   ;;  %s2124_s17 = inlined_call_operand.vmem [shape: f32[1,32], index: 17, kind: input, shape index: {}]   ;;  %s2125_s18 = inlined_call_operand.hbm [shape: f32[8,32], index: 18, kind: output, shape index: {}]  }
   0x1   :  { %2127 = sst [smem:[#allocation19_spill]] %s2107_s0 }
   0x2   :  { %2128 = sst [smem:[#allocation20_spill]] %s2108_s1 }
   0x3   :  { %2129 = sst [smem:[#allocation21_spill]] %s2109_s2 }
   0x4   :  { %23 = vsyncpa [#allocation3], 0 }
   0x5   :  { %24 = vsyncpa [#allocation6], 0 }
   0x6   :  { %25 = vsyncpa [#allocation9], 0 }
   0x7   :  { %26 = vsyncpa [#allocation12], 0 }
   0x8   :  { %27 = vsyncpa [#allocation4], 0  ;;  %s1620_s27 = smov [#allocation5]   ;;  %s1621_s29 = smov [#allocation8]  }
   0x9   :  { %s48_s28 = sshll.u32 %s1620_s27, 4  ;;  %s70_s30 = sshll.u32 %s1621_s29, 4  ;;  %s49_s28 = int_to_ptr.vmem [resolvable:$true] %s48_s28  ;;  %s71_s30 = int_to_ptr.vmem [resolvable:$true] %s70_s30 }
   0xa   :  { %s1478_s0 = scalar_lea.vmem %s49_s28, 16  ;;  %s1482_s19 = scalar_lea.vmem %s49_s28, 32 }
   0xb   :  { %p1479_p0 = scmp.ne.s32.totalorder %s49_s28, %s1478_s0  ;;  %p1483_p1 = scmp.lt.s32.totalorder %s49_s28, %s49_s28 }
   0xc   :  { %p1484_p2 = scmp.lt.s32.totalorder %s1482_s19, %s1478_s0 }
   0xe   :  { %p1485_p3 = por %p1484_p2, %p1483_p1 }
  0x10   :  { %p1486_p4 = pnand %p1485_p3, %p1479_p0 }
  0x12   :  { %1489 = shalt.err (!%p1486_p4)
}
  0x13   :  { %51 = dma.hbm_to_vmem [thread:$0]  %s2110_s3, 16, %s49_s28, [#allocation6]  }
  0x14   :  { %s1498_s21 = scalar_lea.vmem %s71_s30, 16  ;;  %s1502_s22 = scalar_lea.vmem %s71_s30, 32 }
  0x15   :  { %p1499_p5 = scmp.ne.s32.totalorder %s71_s30, %s1498_s21  ;;  %p1503_p6 = scmp.lt.s32.totalorder %s71_s30, %s71_s30 }
  0x16   :  { %p1504_p7 = scmp.lt.s32.totalorder %s1502_s22, %s1498_s21 }
  0x18   :  { %p1505_p8 = por %p1504_p7, %p1503_p6 }
  0x1a   :  { %p1506_p9 = pnand %p1505_p8, %p1499_p5 }
  0x1c   :  { %1509 = shalt.err (!%p1506_p9)
}
  0x1d   :  { %73 = dma.hbm_to_vmem [thread:$0]  %s2112_s5, 16, %s71_s30, [#allocation9]  }
  0x1e   :  { %s1622_s24 = smov [#allocation2]   ;;  %s1623_s26 = smov [#allocation7]  }
  0x1f   :  { %s36_s25 = sshll.u32 %s1622_s24, 4  ;;  %s57_s27 = sshll.u32 %s1623_s26, 4  ;;  %s37_s25 = int_to_ptr.vmem [resolvable:$true] %s36_s25  ;;  %s58_s27 = int_to_ptr.vmem [resolvable:$true] %s57_s27 }
  0x20   :  { %s1518_s29 = scalar_lea.vmem %s37_s25, 128  ;;  %p1523_p11 = scmp.lt.s32.totalorder %s37_s25, %s37_s25 }
  0x21   :  { %p1519_p10 = scmp.ne.s32.totalorder %s37_s25, %s1518_s29  ;;  %p1524_p12 = scmp.lt.s32.totalorder %s1518_s29, %s1518_s29 }
  0x23   :  { %p1525_p13 = por %p1524_p12, %p1523_p11 }
  0x25   :  { %p1526_p0 = pnand %p1525_p13, %p1519_p10 }
  0x27   :  { %1529 = shalt.err (!%p1526_p0)
}
  0x28   :  { %s2130_s0 = sld [smem:[#allocation20_spill]]  ;;  %s1538_s19 = scalar_lea.vmem %s58_s27, 256 }
  0x29   :  { %p1539_p1 = scmp.ne.s32.totalorder %s58_s27, %s1538_s19  ;;  %p1543_p2 = scmp.lt.s32.totalorder %s58_s27, %s58_s27 }
  0x2a   :  { %p1544_p3 = scmp.lt.s32.totalorder %s1538_s19, %s1538_s19 }
  0x2c   :  { %p1545_p4 = por %p1544_p3, %p1543_p2 }
  0x2e   :  { %39 = dma.hbm_to_vmem [thread:$0]  %s2130_s0, 128, %s37_s25, [#allocation3]  }
  0x2f   :  { %p1546_p5 = pnand %p1545_p4, %p1539_p1 }
  0x31   :  { %1549 = shalt.err (!%p1546_p5)
}
  0x32   :  { %s1624_s5 = smov 128   ;;  %s1625_s30 = smov 8  }
  0x33   :  { %63 = dma.hbm_to_vmem [thread:$0]  %s2111_s4, 256, %s58_s27, [#allocation6], %s1624_s5, %s1624_s5, %s1625_s30  }
  0x34   :  { %s1626_s21 = smov [#allocation10]   ;;  %s1627_s2 = smov [#allocation11]  }
  0x35   :  { %s91_s22 = sshll.u32 %s1626_s21, 4  ;;  %s105_s23 = sshll.u32 %s1627_s2, 4  ;;  %s92_s22 = int_to_ptr.vmem [resolvable:$true] %s91_s22  ;;  %s106_s23 = int_to_ptr.vmem [resolvable:$true] %s105_s23 }
  0x36   :  { %s1558_s24 = scalar_lea.vmem %s92_s22, 1024  ;;  %p1563_p7 = scmp.lt.s32.totalorder %s92_s22, %s92_s22 }
  0x37   :  { %p1559_p6 = scmp.ne.s32.totalorder %s92_s22, %s1558_s24  ;;  %p1564_p8 = scmp.lt.s32.totalorder %s1558_s24, %s1558_s24 }
  0x39   :  { %p1565_p9 = por %p1564_p8, %p1563_p7 }
  0x3b   :  { %p1566_p10 = pnand %p1565_p9, %p1559_p6 }
  0x3d   :  { %1569 = shalt.err (!%p1566_p10)
}
  0x3e   :  { %97 = dma.hbm_to_vmem [thread:$0]  %s2119_s12, 1024, %s92_s22, [#allocation9], %s1624_s5, %s1624_s5, %s1625_s30  }
  0x3f   :  { %s1578_s29 = scalar_lea.vmem %s106_s23, 1024  ;;  %p1583_p12 = scmp.lt.s32.totalorder %s106_s23, %s106_s23 }
  0x40   :  { %p1579_p11 = scmp.ne.s32.totalorder %s106_s23, %s1578_s29  ;;  %p1584_p13 = scmp.lt.s32.totalorder %s1578_s29, %s1578_s29 }
  0x42   :  { %p1585_p0 = por %p1584_p13, %p1583_p12 }
  0x44   :  { %p1586_p1 = pnand %p1585_p0, %p1579_p11 }
  0x46   :  { %1589 = shalt.err (!%p1586_p1)
}
  0x47   :  { %111 = dma.hbm_to_vmem [thread:$0]  %s2121_s14, 1024, %s106_s23, [#allocation12], %s1624_s5, %s1624_s5, %s1625_s30  }
  0x48   :  { %1610 = dma.done.wait [#allocation3], 128  }
  0x49   :  { %1611 = vsyncadd [#allocation3], 4294967168 }
  0x4a   :  { %1612 = dma.done.wait [#allocation6], 272  }
  0x4b   :  { %1613 = vsyncadd [#allocation6], 4294967024 }
  0x4c   :  { %1614 = dma.done.wait [#allocation9], 1040  }
  0x4d   :  { %1615 = vsyncadd [#allocation9], 4294966256 }
  0x4e   :  { %1616 = dma.done.wait [#allocation12], 1024  }
  0x4f   :  { %1617 = vsyncadd [#allocation12], 4294966272  ;;  %v1628_v0 = vmov 0.0   ;;  %vm1629_vm0 = vmmov 0   ;;  %vm154_vm1 = vcmask 130048   ;;  %s2131_s3 = sld [smem:[#allocation21_spill]]  ;;  %v284_v23 = vlaneseq }
  0x50   :  { %1269 = vmatprep.subr.mxu0 %v1628_v0  ;;  %1301 = vmatprep.mubr.msk.f32.mxu0 %vm1629_vm0, %v1628_v0  ;;  %v136_v17 = vld [vmem:[#allocation2] sm:$0xff]  ;;  %v1173_v18 = vld [vmem:[#allocation5] ss:$0 sm:$0xff]  ;;  %s2132_s25 = sld [smem:[#allocation19_spill]] }
  0x51   :  { %1304 = vmatprep.subr.mxu1 %v1628_v0  ;;  %1336 = vmatprep.mubr.msk.f32.mxu1 %vm1629_vm0, %v1628_v0  ;;  %v1852_v24 = vand.u32 127, %v284_v23 }
  0x55   :  { %v152_v1 = vld [vmem:[%s2131_s3 + $0x78] sm:$0xff]  ;;  %v151_v2 = vld [vmem:[%s2131_s3 + $0x70] sm:$0xff]  ;;  %v150_v3 = vld [vmem:[%s2131_s3 + $0x68] sm:$0xff] }
  0x56   :  { %1270 = vmatpush3.xpose.msk.msra.mxu0 %vm154_vm1, %v152_v1  ;;  %1305 = vmatpush3.msra.mxu1 %v152_v1  ;;  %v149_v4 = vld [vmem:[%s2131_s3 + $0x60] sm:$0xff]  ;;  %v148_v5 = vld [vmem:[%s2131_s3 + $0x58] sm:$0xff]  ;;  %v147_v6 = vld [vmem:[%s2131_s3 + $0x50] sm:$0xff] }
  0x57   :  { %1271 = vmatprep.subr.mxu0 %v1628_v0  ;;  %1306 = vmatprep.subr.mxu1 %v1628_v0  ;;  %v146_v7 = vld [vmem:[%s2131_s3 + $0x48] sm:$0xff]  ;;  %v145_v8 = vld [vmem:[%s2131_s3 + $0x40] sm:$0xff]  ;;  %v144_v9 = vld [vmem:[%s2131_s3 + $0x38] sm:$0xff] }
  0x58   :  { %1307 = vmatpush3.msra.mxu1 %v151_v2  ;;  %v143_v10 = vld [vmem:[%s2131_s3 + $0x30] sm:$0xff]  ;;  %v142_v11 = vld [vmem:[%s2131_s3 + $0x28] sm:$0xff]  ;;  %v141_v12 = vld [vmem:[%s2131_s3 + $0x20] sm:$0xff] }
  0x59   :  { %1308 = vmatprep.subr.mxu1 %v1628_v0  ;;  %v140_v13 = vld [vmem:[%s2131_s3 + $0x18] sm:$0xff]  ;;  %v139_v14 = vld [vmem:[%s2131_s3 + $0x10] sm:$0xff]  ;;  %v138_v15 = vld [vmem:[%s2131_s3 + $0x8] sm:$0xff] }
  0x5a   :  { %1272 = vmatpush3.xpose.msk.msra.mxu0 %vm154_vm1, %v151_v2  ;;  %1309 = vmatpush3.msra.mxu1 %v150_v3  ;;  %v137_v16 = vld [vmem:[%s2131_s3] sm:$0xff] }
  0x5b   :  { %1273 = vmatprep.subr.mxu0 %v1628_v0  ;;  %1310 = vmatprep.subr.mxu1 %v1628_v0 }
  0x5c   :  { %1311 = vmatpush3.msra.mxu1 %v149_v4 }
  0x5d   :  { %1312 = vmatprep.subr.mxu1 %v1628_v0 }
  0x5e   :  { %1274 = vmatpush3.xpose.msk.msra.mxu0 %vm154_vm1, %v150_v3  ;;  %1313 = vmatpush3.msra.mxu1 %v148_v5 }
  0x5f   :  { %1275 = vmatprep.subr.mxu0 %v1628_v0  ;;  %1314 = vmatprep.subr.mxu1 %v1628_v0 }
  0x60   :  { %1315 = vmatpush3.msra.mxu1 %v147_v6 }
  0x61   :  { %1316 = vmatprep.subr.mxu1 %v1628_v0 }
  0x62   :  { %1276 = vmatpush3.xpose.msk.msra.mxu0 %vm154_vm1, %v149_v4  ;;  %1317 = vmatpush3.msra.mxu1 %v146_v7 }
  0x63   :  { %1277 = vmatprep.subr.mxu0 %v1628_v0  ;;  %1318 = vmatprep.subr.mxu1 %v1628_v0 }
  0x64   :  { %1319 = vmatpush3.msra.mxu1 %v145_v8 }
  0x65   :  { %1320 = vmatprep.subr.mxu1 %v1628_v0 }
  0x66   :  { %1278 = vmatpush3.xpose.msk.msra.mxu0 %vm154_vm1, %v148_v5  ;;  %1321 = vmatpush3.msra.mxu1 %v144_v9 }
  0x67   :  { %1279 = vmatprep.subr.mxu0 %v1628_v0  ;;  %1322 = vmatprep.subr.mxu1 %v1628_v0 }
  0x68   :  { %1323 = vmatpush3.msra.mxu1 %v143_v10 }
  0x69   :  { %1324 = vmatprep.subr.mxu1 %v1628_v0 }
  0x6a   :  { %1280 = vmatpush3.xpose.msk.msra.mxu0 %vm154_vm1, %v147_v6  ;;  %1325 = vmatpush3.msra.mxu1 %v142_v11 }
  0x6b   :  { %1281 = vmatprep.subr.mxu0 %v1628_v0  ;;  %1326 = vmatprep.subr.mxu1 %v1628_v0 }
  0x6c   :  { %1327 = vmatpush3.msra.mxu1 %v141_v12 }
  0x6d   :  { %1328 = vmatprep.subr.mxu1 %v1628_v0 }
  0x6e   :  { %1282 = vmatpush3.xpose.msk.msra.mxu0 %vm154_vm1, %v146_v7  ;;  %1329 = vmatpush3.msra.mxu1 %v140_v13 }
  0x6f   :  { %1283 = vmatprep.subr.mxu0 %v1628_v0  ;;  %1330 = vmatprep.subr.mxu1 %v1628_v0 }
  0x70   :  { %1331 = vmatpush3.msra.mxu1 %v139_v14 }
  0x71   :  { %1332 = vmatprep.subr.mxu1 %v1628_v0 }
  0x72   :  { %1284 = vmatpush3.xpose.msk.msra.mxu0 %vm154_vm1, %v145_v8  ;;  %1333 = vmatpush3.msra.mxu1 %v138_v15 }
  0x73   :  { %1285 = vmatprep.subr.mxu0 %v1628_v0  ;;  %1334 = vmatprep.subr.mxu1 %v1628_v0 }
  0x74   :  { %1335 = vmatpush3.msra.mxu1 %v137_v16 }
  0x75   :  { %1339 = vmatprep.subr.mxu1 %v1628_v0 }
  0x76   :  { %1286 = vmatpush3.xpose.msk.msra.mxu0 %vm154_vm1, %v144_v9 }
  0x77   :  { %1287 = vmatprep.subr.mxu0 %v1628_v0 }
  0x7a   :  { %1288 = vmatpush3.xpose.msk.msra.mxu0 %vm154_vm1, %v143_v10 }
  0x7b   :  { %1289 = vmatprep.subr.mxu0 %v1628_v0 }
  0x7e   :  { %1290 = vmatpush3.xpose.msk.msra.mxu0 %vm154_vm1, %v142_v11 }
  0x7f   :  { %1291 = vmatprep.subr.mxu0 %v1628_v0 }
  0x82   :  { %1292 = vmatpush3.xpose.msk.msra.mxu0 %vm154_vm1, %v141_v12 }
  0x83   :  { %1293 = vmatprep.subr.mxu0 %v1628_v0 }
  0x86   :  { %1294 = vmatpush3.xpose.msk.msra.mxu0 %vm154_vm1, %v140_v13 }
  0x87   :  { %1295 = vmatprep.subr.mxu0 %v1628_v0 }
  0x8a   :  { %1296 = vmatpush3.xpose.msk.msra.mxu0 %vm154_vm1, %v139_v14 }
  0x8b   :  { %1297 = vmatprep.subr.mxu0 %v1628_v0 }
  0x8e   :  { %1298 = vmatpush3.xpose.msk.msra.mxu0 %vm154_vm1, %v138_v15 }
  0x8f   :  { %1299 = vmatprep.subr.mxu0 %v1628_v0 }
  0x92   :  { %1300 = vmatpush3.xpose.msk.msra.mxu0 %vm154_vm1, %v137_v16 }
  0x93   :  { %1365 = vmatprep.subr.mxu0 %v1628_v0 }
  0x95   :  { %1302 = vmatmul.mubr.msk.f32.vlgmr.msra.gmra.mxu0 %vm154_vm1, %v136_v17 }
  0x96   :  { %1381 = vmatprep.mubr.msk.f32.mxu0 %vm1629_vm0, %v1628_v0 }
 0x155   :  { %v272_v19 = vpop.f32.mrf.mxu0 }
 0x156   :  { %v276_v20 = vmul.f32 -2.0, %v272_v19 }
 0x157   :  { %v1303_v21 = vpop.f32.mrf.mxu0 }
 0x158   :  { %v283_v22 = vadd.f32 %v1173_v18, %v276_v20  ;;  %v1630_v18 = vmov 0  }
 0x159   :  { %1454 = vset.pattern.permute.xlu1 %v1630_v18  ;;  %1455 = vset.pattern.permute.xlu0 %v1630_v18 }
 0x15a   :  { %287 = vmin.xlane.f32.xlu0 %v283_v22 }
 0x1e3   :  { %v288_v25 = vpop.xlane.xlu0 %287 }
 0x1e4   :  { %vm289_vm2 = vcmp.eq.f32.partialorder %v283_v22, %v288_v25  ;;  %v286_v25 = vld [vmem:[%s2132_s25] sm:$0xff] }
 0x1e5   :  { %v290_v26 = vsel %vm289_vm2, %v1852_v24, 128  ;;  %vm306_vm15 = vcmp.eq.s32.totalorder %v286_v25, 0  ;;  %vm362_vm2 = vcmp.eq.s32.totalorder %v286_v25, 2 }
 0x1e6   :  { %v292_v27 = vshra.s32 %v290_v26, 16  ;;  %v291_v29 = vand.u32 65535, %v290_v26  ;;  %v307_v26 = vsel %vm306_vm15, 1, %v1630_v18 }
 0x1e8   :  { %v294_v28 = vcvt.s32.f32 %v292_v27  ;;  %v293_v31 = vcvt.s32.f32 %v291_v29  ;;  %v363_v27 = vsel %vm362_vm2, 1, %v1630_v18 }
 0x1ea   :  { %295 = vmin.xlane.f32.xlu0 %v294_v28 }
 0x273   :  { %v296_v30 = vpop.xlane.xlu0 %295 }
 0x274   :  { %vm297_vm3 = vcmp.eq.f32.partialorder %v294_v28, %v296_v30  ;;  %v302_v33 = vcvt.f32.s32 %v296_v30 }
 0x275   :  { %v298_v32 = vsel %vm297_vm3, %v293_v31, inf  ;;  %vm390_vm3 = vcmp.eq.s32.totalorder %v286_v25, 3 }
 0x276   :  { %299 = vmin.xlane.f32.xlu1 %v298_v32  ;;  %v303_v35 = vshll.u32 %v302_v33, 16  ;;  %v391_v28 = vsel %vm390_vm3, 1, %v1630_v18 }
 0x2ff   :  { %v300_v34 = vpop.xlane.xlu1 %299 }
 0x300   :  { %v301_v36 = vcvt.f32.s32 %v300_v34 }
 0x302   :  { %v1855_v37 = vadd.s32 %v303_v35, %v301_v36 }
 0x304   :  { %vm305_vm4 = vcmp.eq.s32.totalorder %v1852_v24, %v1855_v37 }
 0x305   :  { %v314_v38 = vsel %vm305_vm4, inf, %v283_v22 }
 0x306   :  { %315 = vmin.xlane.f32.xlu1 %v314_v38 }
 0x38f   :  { %v316_v39 = vpop.xlane.xlu1 %315 }
 0x390   :  { %vm317_vm5 = vcmp.eq.f32.partialorder %v314_v38, %v316_v39 }
 0x391   :  { %v318_v40 = vsel %vm317_vm5, %v1852_v24, 128  ;;  %vm418_vm5 = vcmp.eq.s32.totalorder %v286_v25, 4 }
 0x392   :  { %v320_v41 = vshra.s32 %v318_v40, 16  ;;  %v319_v43 = vand.u32 65535, %v318_v40  ;;  %v419_v29 = vsel %vm418_vm5, 1, %v1630_v18 }
 0x394   :  { %v322_v42 = vcvt.s32.f32 %v320_v41  ;;  %v321_v45 = vcvt.s32.f32 %v319_v43 }
 0x396   :  { %323 = vmin.xlane.f32.xlu0 %v322_v42 }
 0x41f   :  { %v324_v44 = vpop.xlane.xlu0 %323 }
 0x420   :  { %vm325_vm6 = vcmp.eq.f32.partialorder %v322_v42, %v324_v44  ;;  %v330_v47 = vcvt.f32.s32 %v324_v44 }
 0x421   :  { %v326_v46 = vsel %vm325_vm6, %v321_v45, inf }
 0x422   :  { %327 = vmin.xlane.f32.xlu1 %v326_v46  ;;  %v331_v49 = vshll.u32 %v330_v47, 16 }
 0x4ab   :  { %v328_v48 = vpop.xlane.xlu1 %327 }
 0x4ac   :  { %v329_v50 = vcvt.f32.s32 %v328_v48 }
 0x4ae   :  { %v1863_v51 = vadd.s32 %v331_v49, %v329_v50  ;;  %v497_v49 = vld [vmem:[#allocation7 + $0x8] sm:$0xff] }
 0x4b0   :  { %vm333_vm7 = vcmp.eq.s32.totalorder %v1852_v24, %v1863_v51 }
 0x4b1   :  { %v342_v52 = vsel %vm333_vm7, inf, %v314_v38 }
 0x4b2   :  { %343 = vmin.xlane.f32.xlu0 %v342_v52 }
 0x53b   :  { %v344_v53 = vpop.xlane.xlu0 %343 }
 0x53c   :  { %vm345_vm8 = vcmp.eq.f32.partialorder %v342_v52, %v344_v53  ;;  %v586_v53 = vld [vmem:[%s2113_s6 + $0x38] sm:$0xff] }
 0x53d   :  { %v346_v54 = vsel %vm345_vm8, %v1852_v24, 128  ;;  %vm334_vm8 = vcmp.eq.s32.totalorder %v286_v25, 1 }
 0x53e   :  { %v348_v55 = vshra.s32 %v346_v54, 16  ;;  %v347_v57 = vand.u32 65535, %v346_v54  ;;  %v335_v34 = vsel %vm334_vm8, 1, %v1630_v18  ;;  %v585_v54 = vld [vmem:[%s2113_s6 + $0x30] sm:$0xff]  ;;  %v669_v18 = vld [vmem:[%s2115_s8] sm:$0xff] }
 0x540   :  { %v350_v56 = vcvt.s32.f32 %v348_v55  ;;  %v349_v59 = vcvt.s32.f32 %v347_v57  ;;  %v584_v55 = vld [vmem:[%s2113_s6 + $0x28] sm:$0xff]  ;;  %v582_v57 = vld [vmem:[%s2113_s6 + $0x18] sm:$0xff] }
 0x542   :  { %351 = vmin.xlane.f32.xlu1 %v350_v56 }
 0x5cb   :  { %v352_v58 = vpop.xlane.xlu1 %351 }
 0x5cc   :  { %vm353_vm9 = vcmp.eq.f32.partialorder %v350_v56, %v352_v58  ;;  %v358_v61 = vcvt.f32.s32 %v352_v58  ;;  %v583_v56 = vld [vmem:[%s2113_s6 + $0x20] sm:$0xff]  ;;  %v581_v58 = vld [vmem:[%s2113_s6 + $0x10] sm:$0xff] }
 0x5cd   :  { %v354_v60 = vsel %vm353_vm9, %v349_v59, inf  ;;  %v580_v59 = vld [vmem:[%s2113_s6 + $0x8] sm:$0xff] }
 0x5ce   :  { %355 = vmin.xlane.f32.xlu0 %v354_v60  ;;  %v359_v63 = vshll.u32 %v358_v61, 16  ;;  %v579_v60 = vld [vmem:[%s2113_s6] sm:$0xff]  ;;  %v1174_v61 = vld [vmem:[#allocation8] ss:$0 sm:$0xff] }
 0x657   :  { %v356_v62 = vpop.xlane.xlu0 %355 }
 0x658   :  { %v357_v1 = vcvt.f32.s32 %v356_v62 }
 0x65a   :  { %v1871_v2 = vadd.s32 %v359_v63, %v357_v1 }
 0x65c   :  { %vm361_vm10 = vcmp.eq.s32.totalorder %v1852_v24, %v1871_v2 }
 0x65d   :  { %v370_v3 = vsel %vm361_vm10, inf, %v342_v52  ;;  %v496_v52 = vld [vmem:[#allocation7] sm:$0xff] }
 0x65e   :  { %371 = vmin.xlane.f32.xlu1 %v370_v3 }
 0x6e7   :  { %v372_v4 = vpop.xlane.xlu1 %371 }
 0x6e8   :  { %vm373_vm11 = vcmp.eq.f32.partialorder %v370_v3, %v372_v4  ;;  %v683_v4 = vld [vmem:[%s2115_s8 + $0x70] sm:$0xff] }
 0x6e9   :  { %v374_v5 = vsel %vm373_vm11, %v1852_v24, 128 }
 0x6ea   :  { %v376_v6 = vshra.s32 %v374_v5, 16  ;;  %v375_v8 = vand.u32 65535, %v374_v5  ;;  %v682_v5 = vld [vmem:[%s2115_s8 + $0x68] sm:$0xff] }
 0x6ec   :  { %v378_v7 = vcvt.s32.f32 %v376_v6  ;;  %v377_v10 = vcvt.s32.f32 %v375_v8  ;;  %v681_v6 = vld [vmem:[%s2115_s8 + $0x60] sm:$0xff]  ;;  %v679_v8 = vld [vmem:[%s2115_s8 + $0x50] sm:$0xff] }
 0x6ee   :  { %379 = vmin.xlane.f32.xlu0 %v378_v7 }
 0x777   :  { %v380_v9 = vpop.xlane.xlu0 %379 }
 0x778   :  { %vm381_vm12 = vcmp.eq.f32.partialorder %v378_v7, %v380_v9  ;;  %v386_v12 = vcvt.f32.s32 %v380_v9  ;;  %v680_v7 = vld [vmem:[%s2115_s8 + $0x58] sm:$0xff]  ;;  %v678_v9 = vld [vmem:[%s2115_s8 + $0x48] sm:$0xff] }
 0x779   :  { %v382_v11 = vsel %vm381_vm12, %v377_v10, inf  ;;  %v677_v10 = vld [vmem:[%s2115_s8 + $0x40] sm:$0xff] }
 0x77a   :  { %383 = vmin.xlane.f32.xlu1 %v382_v11  ;;  %v387_v14 = vshll.u32 %v386_v12, 16  ;;  %v676_v11 = vld [vmem:[%s2115_s8 + $0x38] sm:$0xff]  ;;  %v675_v12 = vld [vmem:[%s2115_s8 + $0x30] sm:$0xff] }
 0x803   :  { %v384_v13 = vpop.xlane.xlu1 %383 }
 0x804   :  { %v385_v15 = vcvt.f32.s32 %v384_v13  ;;  %v674_v13 = vld [vmem:[%s2115_s8 + $0x28] sm:$0xff] }
 0x806   :  { %v388_v16 = vadd.s32 %v387_v14, %v385_v15  ;;  %v673_v14 = vld [vmem:[%s2115_s8 + $0x20] sm:$0xff]  ;;  %v672_v15 = vld [vmem:[%s2115_s8 + $0x18] sm:$0xff] }
 0x808   :  { %vm389_vm13 = vcmp.eq.s32.totalorder %v1852_v24, %v388_v16  ;;  %v671_v16 = vld [vmem:[%s2115_s8 + $0x10] sm:$0xff] }
 0x809   :  { %v398_v17 = vsel %vm389_vm13, inf, %v370_v3  ;;  %v684_v3 = vld [vmem:[%s2115_s8 + $0x78] sm:$0xff] }
 0x80a   :  { %399 = vmin.xlane.f32.xlu0 %v398_v17 }
 0x893   :  { %v400_v19 = vpop.xlane.xlu0 %399 }
 0x894   :  { %vm401_vm14 = vcmp.eq.f32.partialorder %v398_v17, %v400_v19  ;;  %v670_v17 = vld [vmem:[%s2115_s8 + $0x8] sm:$0xff]  ;;  %v1176_v19 = vld [vmem:[%s2114_s7] ss:$0 sm:$0xff] }
 0x895   :  { %v402_v20 = vsel %vm401_vm14, %v1852_v24, 128 }
 0x896   :  { %v404_v21 = vshra.s32 %v402_v20, 16  ;;  %v403_v30 = vand.u32 65535, %v402_v20 }
 0x898   :  { %v406_v22 = vcvt.s32.f32 %v404_v21  ;;  %v405_v32 = vcvt.s32.f32 %v403_v30  ;;  %v777_v30 = vld [vmem:[%s2117_s10 + $0x18] sm:$0xff] }
 0x89a   :  { %407 = vmin.xlane.f32.xlu1 %v406_v22 }
 0x8ab   :  { %309 = vperm.xlu1 %1454, %v307_v26   ;;  %v781_v26 = vld [vmem:[%s2117_s10 + $0x38] sm:$0xff] }
 0x8ac   :  { %1366 = vmatpush3.msra.mxu0 %v781_v26  ;;  %v1185_v26 = vld [vmem:[%s2124_s17] ss:$0 sm:$0xff] }
 0x8ad   :  { %1367 = vmatprep.subr.mxu0 %v1628_v0 }
 0x8af   :  { %365 = vperm.xlu1 %1454, %v363_v27   ;;  %v780_v27 = vld [vmem:[%s2117_s10 + $0x30] sm:$0xff] }
 0x8b0   :  { %1368 = vmatpush3.msra.mxu0 %v780_v27 }
 0x8b1   :  { %1369 = vmatprep.subr.mxu0 %v1628_v0 }
 0x8b3   :  { %393 = vperm.xlu1 %1454, %v391_v28   ;;  %v779_v28 = vld [vmem:[%s2117_s10 + $0x28] sm:$0xff] }
 0x8b4   :  { %1370 = vmatpush3.msra.mxu0 %v779_v28 }
 0x8b5   :  { %1371 = vmatprep.subr.mxu0 %v1628_v0 }
 0x8b7   :  { %421 = vperm.xlu1 %1454, %v419_v29   ;;  %v778_v29 = vld [vmem:[%s2117_s10 + $0x20] sm:$0xff] }
 0x8b8   :  { %1372 = vmatpush3.msra.mxu0 %v778_v29 }
 0x8b9   :  { %1373 = vmatprep.subr.mxu0 %v1628_v0 }
 0x8ba   :  { %1374 = vmatpush3.msra.mxu0 %v777_v30 }
 0x8bb   :  { %1375 = vmatprep.subr.mxu0 %v1628_v0 }
 0x923   :  { %v408_v31 = vpop.xlane.xlu1 %407 }
 0x924   :  { %vm409_vm6 = vcmp.eq.f32.partialorder %v406_v22, %v408_v31  ;;  %v414_v38 = vcvt.f32.s32 %v408_v31  ;;  %v776_v31 = vld [vmem:[%s2117_s10 + $0x10] sm:$0xff] }
 0x925   :  { %v410_v33 = vsel %vm409_vm6, %v405_v32, inf  ;;  %v775_v32 = vld [vmem:[%s2117_s10 + $0x8] sm:$0xff]  ;;  %1376 = vmatpush3.msra.mxu0 %v776_v31 }
 0x926   :  { %411 = vmin.xlane.f32.xlu0 %v410_v33  ;;  %v415_v41 = vshll.u32 %v414_v38, 16  ;;  %1377 = vmatprep.subr.mxu0 %v1628_v0  ;;  %v774_v33 = vld [vmem:[%s2117_s10] sm:$0xff]  ;;  %s1631_s10 = smov 64  }
 0x927   :  { %v310_v35 = vpop.permute.xlu1 %309  ;;  %1378 = vmatpush3.msra.mxu0 %v775_v32 }
 0x928   :  { %vm311_vm9 = vcmp.eq.s32.totalorder %v310_v35, 1  ;;  %1379 = vmatprep.subr.mxu0 %v1628_v0 }
 0x929   :  { %vm312_vm11 = vmand %vm305_vm4, %vm311_vm9  ;;  %1380 = vmatpush3.msra.mxu0 %v774_v33 }
 0x92a   :  { %v313_v46 = vsel %vm312_vm11, 1.0, %v1628_v0  ;;  %1403 = vmatprep.subr.mxu0 %v1628_v0 }
 0x92b   :  { %v366_v36 = vpop.permute.xlu1 %365 }
 0x92c   :  { %vm367_vm12 = vcmp.eq.s32.totalorder %v366_v36, 1  ;;  %v2033_v36 = vld [vmem:[%s2116_s9] sm:$0x3] }
 0x92d   :  { %vm368_vm5 = vmand %vm361_vm10, %vm367_vm12 }
 0x92f   :  { %v394_v42 = vpop.permute.xlu1 %393 }
 0x930   :  { %vm395_vm14 = vcmp.eq.s32.totalorder %v394_v42, 1 }
 0x931   :  { %vm396_vm4 = vmand %vm389_vm13, %vm395_vm14 }
 0x933   :  { %v422_v45 = vpop.permute.xlu1 %421 }
 0x934   :  { %vm423_vm6 = vcmp.eq.s32.totalorder %v422_v45, 1  ;;  %v868_v45 = vld [vmem:[#allocation10 + $0x28] sm:$0xff] }
 0x93c   :  { %337 = vperm.xlu0 %1455, %v335_v34   ;;  %v2027_v34 = vshrl.u32 %v284_v23, 7  ;;  %v870_v23 = vld [vmem:[#allocation10 + $0x38] sm:$0xff] }
 0x93e   :  { %v689_v35 = vsub.s32 0, %v2027_v34 }
 0x940   :  { %v690_v38 = vrot.slane %v2033_v36, %v689_v35 }
 0x9af   :  { %v412_v39 = vpop.xlane.xlu0 %411 }
 0x9b0   :  { %v413_v40 = vcvt.f32.s32 %v412_v39 }
 0x9b2   :  { %v416_v43 = vadd.s32 %v415_v41, %v413_v40 }
 0x9b4   :  { %vm417_vm3 = vcmp.eq.s32.totalorder %v1852_v24, %v416_v43  ;;  %v869_v43 = vld [vmem:[#allocation10 + $0x30] sm:$0xff] }
 0x9b5   :  { %vm424_vm8 = vmand %vm417_vm3, %vm423_vm6 }
 0x9b7   :  { %v338_v44 = vpop.permute.xlu0 %337 }
 0x9b8   :  { %vm339_vm15 = vcmp.eq.s32.totalorder %v338_v44, 1  ;;  %v964_v44 = vld [vmem:[#allocation11 + $0x38] sm:$0xff] }
 0x9b9   :  { %vm340_vm2 = vmand %vm333_vm7, %vm339_vm15 }
 0x9ba   :  { %v341_v47 = vsel %vm340_vm2, 1.0, %v313_v46  ;;  %v963_v46 = vld [vmem:[#allocation11 + $0x30] sm:$0xff] }
 0x9bb   :  { %v369_v37 = vsel %vm368_vm5, 1.0, %v341_v47  ;;  %v867_v47 = vld [vmem:[#allocation10 + $0x20] sm:$0xff] }
 0x9bc   :  { %v397_v48 = vsel %vm396_vm4, 1.0, %v369_v37  ;;  %v962_v37 = vld [vmem:[#allocation11 + $0x28] sm:$0xff] }
 0x9bd   :  { %v425_v50 = vsel %vm424_vm8, 1.0, %v397_v48  ;;  %v866_v48 = vld [vmem:[#allocation10 + $0x18] sm:$0xff] }
 0x9be   :  { %1337 = vmatmul.mubr.f32.vlgmr.msra.gmra.mxu1 %v425_v50  ;;  %v865_v50 = vld [vmem:[#allocation10 + $0x10] sm:$0xff] }
 0x9bf   :  { %1340 = vmatpush3.msra.mxu1 %v497_v49  ;;  %1343 = vmatprep.mubr.msk.f32.mxu1 %vm1629_vm0, %v1628_v0  ;;  %v961_v49 = vld [vmem:[#allocation11 + $0x20] sm:$0xff] }
 0x9c0   :  { %1341 = vmatprep.subr.mxu1 %v1628_v0 }
 0x9c1   :  { %1342 = vmatpush3.msra.mxu1 %v496_v52  ;;  %v960_v52 = vld [vmem:[#allocation11 + $0x18] sm:$0xff] }
 0x9c2   :  { %1346 = vmatprep.subr.mxu1 %v1628_v0 }
 0xa7e   :  { %v492_v51 = vpop.f32.mrf.mxu1 }
 0xa7f   :  { %1344 = vmatmul.mubr.msk.f32.vlgmr.msra.gmra.mxu1 %vm154_vm1, %v492_v51  ;;  %vm594_vm1 = vcmask 523264   ;;  %v864_v51 = vld [vmem:[#allocation10 + $0x8] sm:$0xff] }
 0xa80   :  { %v1338_v24 = vpop.f32.mrf.mxu1  ;;  %1362 = vmatprep.mubr.msk.f32.mxu1 %vm1629_vm0, %v1628_v0  ;;  %1347 = vmatpush3.msra.mxu1 %v586_v53  ;;  %v863_v53 = vld [vmem:[#allocation10] sm:$0xff] }
 0xa81   :  { %1348 = vmatprep.subr.mxu1 %v1628_v0  ;;  %v959_v24 = vld [vmem:[#allocation11 + $0x10] sm:$0xff] }
 0xa82   :  { %1349 = vmatpush3.msra.mxu1 %v585_v54  ;;  %v958_v54 = vld [vmem:[#allocation11 + $0x8] sm:$0xff] }
 0xa83   :  { %1350 = vmatprep.subr.mxu1 %v1628_v0 }
 0xa84   :  { %1351 = vmatpush3.msra.mxu1 %v584_v55  ;;  %v957_v55 = vld [vmem:[#allocation11] sm:$0xff] }
 0xa85   :  { %1352 = vmatprep.subr.mxu1 %v1628_v0 }
 0xa86   :  { %1353 = vmatpush3.msra.mxu1 %v583_v56  ;;  %v1179_v56 = vld [vmem:[%s2118_s11] ss:$0 sm:$0xff] }
 0xa87   :  { %1354 = vmatprep.subr.mxu1 %v1628_v0 }
 0xa88   :  { %1355 = vmatpush3.msra.mxu1 %v582_v57 }
 0xa89   :  { %1356 = vmatprep.subr.mxu1 %v1628_v0 }
 0xa8a   :  { %1357 = vmatpush3.msra.mxu1 %v581_v58 }
 0xa8b   :  { %1358 = vmatprep.subr.mxu1 %v1628_v0 }
 0xa8c   :  { %1359 = vmatpush3.msra.mxu1 %v580_v59 }
 0xa8d   :  { %1360 = vmatprep.subr.mxu1 %v1628_v0 }
 0xa8e   :  { %1361 = vmatpush3.msra.mxu1 %v579_v60 }
 0xa8f   :  { %716 = vmatprep.subr.mxu1 %v684_v3  ;;  %v1052_v3 = vld [vmem:[%s2123_s16 + $0x20] sm:$0xff] }
 0xb3f   :  { %v574_v62 = vpop.f32.mrf.mxu1 }
 0xb40   :  { %v575_v63 = vadd.f32 %v1174_v61, %v574_v62 }
 0xb41   :  { %v1345_v1 = vpop.f32.mrf.mxu1 }
 0xb42   :  { %1456 = vtanh.f32 %v575_v63  ;;  %v1055_v63 = vld [vmem:[%s2123_s16 + $0x38] sm:$0xff]  ;;  %v1054_v1 = vld [vmem:[%s2123_s16 + $0x30] sm:$0xff] }
 0xb4f   :  { %v1457_v2 = vpop.eup %1456 }
 0xb50   :  { %1363 = vmatmul.mubr.msk.f32.vlgmr.msra.gmra.mxu1 %vm594_vm1, %v1457_v2  ;;  %v1053_v2 = vld [vmem:[%s2123_s16 + $0x28] sm:$0xff] }
 0xb51   :  { %764 = vmatprep.mubr.f32.mxu1 %v1628_v0  ;;  %717 = vmatpush1.msra.mxu1 %v683_v4  ;;  %v1051_v4 = vld [vmem:[%s2123_s16 + $0x18] sm:$0xff] }
 0xb52   :  { %718 = vmatprep.subr.mxu1 %v682_v5  ;;  %v1050_v5 = vld [vmem:[%s2123_s16 + $0x10] sm:$0xff] }
 0xb53   :  { %719 = vmatpush1.msra.mxu1 %v681_v6  ;;  %v1049_v6 = vld [vmem:[%s2123_s16 + $0x8] sm:$0xff] }
 0xb54   :  { %720 = vmatprep.subr.mxu1 %v680_v7  ;;  %v1048_v7 = vld [vmem:[%s2123_s16] sm:$0xff] }
 0xb55   :  { %721 = vmatpush1.msra.mxu1 %v679_v8  ;;  %v693_v8 = vsub.s32 1, %v2027_v34 }
 0xb56   :  { %722 = vmatprep.subr.mxu1 %v678_v9 }
 0xb57   :  { %723 = vmatpush1.msra.mxu1 %v677_v10  ;;  %v694_v9 = vrot.slane %v2033_v36, %v693_v8 }
 0xb58   :  { %724 = vmatprep.subr.mxu1 %v676_v11 }
 0xb59   :  { %725 = vmatpush1.msra.mxu1 %v675_v12  ;;  %v1181_v12 = vld [vmem:[%s2120_s13] ss:$0 sm:$0xff] }
 0xb5a   :  { %726 = vmatprep.subr.mxu1 %v674_v13 }
 0xb5b   :  { %727 = vmatpush1.msra.mxu1 %v673_v14  ;;  %v1183_v14 = vld [vmem:[%s2122_s15] ss:$0 sm:$0xff]  ;;  %s1632_s15 = smov [#allocation13]  }
 0xb5c   :  { %728 = vmatprep.subr.mxu1 %v672_v15  ;;  %s1144_s26 = sshll.u32 %s1632_s15, 4  ;;  %s1145_s26 = int_to_ptr.vmem [resolvable:$true] %s1144_s26 }
 0xb5d   :  { %729 = vmatpush1.msra.mxu1 %v671_v16  ;;  %s1590_s29 = scalar_lea.vmem %s1145_s26, 128  ;;  %p1595_p3 = scmp.lt.s32.totalorder %s1145_s26, %s1145_s26 }
 0xb5e   :  { %730 = vmatprep.subr.mxu1 %v670_v17  ;;  %p1591_p2 = scmp.ne.s32.totalorder %s1145_s26, %s1590_s29  ;;  %p1596_p4 = scmp.lt.s32.totalorder %s1590_s29, %s1590_s29 }
 0xb5f   :  { %731 = vmatpush1.msra.mxu1 %v669_v18 }
 0xb60   :  { %1384 = vmatprep.subr.mxu1 %v1628_v0  ;;  %p1597_p5 = por %p1596_p4, %p1595_p3 }
 0xb62   :  { %p1598_p6 = pnand %p1597_p5, %p1591_p2 }
 0xc10   :  { %v664_v20 = vpop.f32.mrf.mxu1 }
 0xc11   :  { %v665_v21 = vadd.f32 %v1176_v19, %v664_v20 }
 0xc12   :  { %v1364_v22 = vpop.f32.mrf.mxu1 }
 0xc13   :  { %1458 = vtanh.f32 %v665_v21 }
 0xc20   :  { %v1459_v25 = vpop.eup %1458 }
 0xc21   :  { %1178 = vmatmul.mubr.msk.f32.vlgmr.msra.gmra.mxu1 %vm594_vm1, %v1459_v25 }
 0xc22   :  { %1400 = vmatprep.mubr.msk.f32.mxu1 %vm1629_vm0, %v1628_v0  ;;  %1385 = vmatpush3.msra.mxu1 %v870_v23 }
 0xc23   :  { %1386 = vmatprep.subr.mxu1 %v1628_v0 }
 0xc24   :  { %1387 = vmatpush3.msra.mxu1 %v869_v43 }
 0xc25   :  { %1388 = vmatprep.subr.mxu1 %v1628_v0 }
 0xc26   :  { %1389 = vmatpush3.msra.mxu1 %v868_v45 }
 0xc27   :  { %1390 = vmatprep.subr.mxu1 %v1628_v0 }
 0xc28   :  { %1391 = vmatpush3.msra.mxu1 %v867_v47 }
 0xc29   :  { %1392 = vmatprep.subr.mxu1 %v1628_v0 }
 0xc2a   :  { %1393 = vmatpush3.msra.mxu1 %v866_v48 }
 0xc2b   :  { %1394 = vmatprep.subr.mxu1 %v1628_v0 }
 0xc2c   :  { %1395 = vmatpush3.msra.mxu1 %v865_v50 }
 0xc2d   :  { %1396 = vmatprep.subr.mxu1 %v1628_v0 }
 0xc2e   :  { %1397 = vmatpush3.msra.mxu1 %v864_v51 }
 0xc2f   :  { %1398 = vmatprep.subr.mxu1 %v1628_v0 }
 0xc30   :  { %1399 = vmatpush3.msra.mxu1 %v863_v53 }
 0xc31   :  { %1422 = vmatprep.subr.mxu1 %v1628_v0 }
 0xce1   :  { %v766_v39 = vpop.f32.mrf.mxu1 }
 0xce2   :  { %v767_v40 = vadd.f32 %v766_v39, %v690_v38 }
 0xce3   :  { %v768_v10 = vpop.f32.mrf.mxu1 }
 0xce4   :  { %1460 = vtanh.f32 %v767_v40  ;;  %v769_v11 = vadd.f32 %v768_v10, %v694_v9 }
 0xcf1   :  { %v1461_v41 = vpop.eup %1460 }
 0xcf2   :  { %953 = vrot.lane.b32.xlu1 %v1461_v41, %s1631_s10  ;;  %v773_v42 = vadd.f32 %v1461_v41, %v1459_v25 }
 0xcf4   :  { %1382 = vmatmul.mubr.msk.f32.vlgmr.msra.gmra.mxu0 %vm594_vm1, %v773_v42 }
 0xcf5   :  { %1419 = vmatprep.mubr.msk.f32.mxu0 %vm1629_vm0, %v1628_v0  ;;  %1404 = vmatpush3.msra.mxu0 %v964_v44 }
 0xcf6   :  { %1405 = vmatprep.subr.mxu0 %v1628_v0 }
 0xcf7   :  { %1406 = vmatpush3.msra.mxu0 %v963_v46 }
 0xcf8   :  { %1407 = vmatprep.subr.mxu0 %v1628_v0 }
 0xcf9   :  { %1408 = vmatpush3.msra.mxu0 %v962_v37 }
 0xcfa   :  { %1409 = vmatprep.subr.mxu0 %v1628_v0 }
 0xcfb   :  { %1410 = vmatpush3.msra.mxu0 %v961_v49 }
 0xcfc   :  { %1411 = vmatprep.subr.mxu0 %v1628_v0 }
 0xcfd   :  { %1412 = vmatpush3.msra.mxu0 %v960_v52 }
 0xcfe   :  { %1413 = vmatprep.subr.mxu0 %v1628_v0 }
 0xcff   :  { %1414 = vmatpush3.msra.mxu0 %v959_v24 }
 0xd00   :  { %1415 = vmatprep.subr.mxu0 %v1628_v0 }
 0xd01   :  { %1416 = vmatpush3.msra.mxu0 %v958_v54 }
 0xd02   :  { %1417 = vmatprep.subr.mxu0 %v1628_v0 }
 0xd03   :  { %1418 = vmatpush3.msra.mxu0 %v957_v55 }
 0xd64   :  { %v954_v61 = vpop.permute.xlu1 %953 }
 0xdb4   :  { %v858_v57 = vpop.f32.mrf.mxu0 }
 0xdb5   :  { %v859_v58 = vadd.f32 %v1179_v56, %v858_v57 }
 0xdb6   :  { %v1383_v59 = vpop.f32.mrf.mxu0 }
 0xdb7   :  { %1462 = vtanh.f32 %v859_v58 }
 0xdb8   :  { %1464 = vtanh.f32 %v769_v11 }
 0xdc4   :  { %v1463_v60 = vpop.eup %1462 }
 0xdc5   :  { %1401 = vmatmul.mubr.msk.f32.vlgmr.msra.gmra.mxu1 %vm594_vm1, %v1463_v60  ;;  %v956_v62 = vadd.f32 %v1463_v60, %v954_v61  ;;  %v1465_v19 = vpop.eup %1464 }
 0xdc6   :  { %1438 = vmatprep.mubr.msk.f32.mxu1 %vm1629_vm0, %v1628_v0  ;;  %1423 = vmatpush3.msra.mxu1 %v1055_v63  ;;  %vm1136_vm0 = vcmask 261120  }
 0xdc7   :  { %1420 = vmatmul.mubr.msk.f32.vlgmr.msra.gmra.mxu0 %vm594_vm1, %v956_v62  ;;  %1424 = vmatprep.subr.mxu1 %v1628_v0 }
 0xdc8   :  { %1425 = vmatpush3.msra.mxu1 %v1054_v1 }
 0xdc9   :  { %1426 = vmatprep.subr.mxu1 %v1628_v0 }
 0xdca   :  { %1427 = vmatpush3.msra.mxu1 %v1053_v2 }
 0xdcb   :  { %1428 = vmatprep.subr.mxu1 %v1628_v0 }
 0xdcc   :  { %1429 = vmatpush3.msra.mxu1 %v1052_v3 }
 0xdcd   :  { %1430 = vmatprep.subr.mxu1 %v1628_v0 }
 0xdce   :  { %1431 = vmatpush3.msra.mxu1 %v1051_v4 }
 0xdcf   :  { %1432 = vmatprep.subr.mxu1 %v1628_v0 }
 0xdd0   :  { %1433 = vmatpush3.msra.mxu1 %v1050_v5 }
 0xdd1   :  { %1434 = vmatprep.subr.mxu1 %v1628_v0 }
 0xdd2   :  { %1435 = vmatpush3.msra.mxu1 %v1049_v6 }
 0xdd3   :  { %1436 = vmatprep.subr.mxu1 %v1628_v0 }
 0xdd4   :  { %1437 = vmatpush3.msra.mxu1 %v1048_v7 }
 0xe85   :  { %v947_v13 = vpop.f32.mrf.mxu1 }
 0xe86   :  { %v948_v15 = vadd.f32 %v1181_v12, %v947_v13 }
 0xe87   :  { %v1402_v16 = vpop.f32.mrf.mxu1  ;;  %v1041_v0 = vpop.f32.mrf.mxu0 }
 0xe88   :  { %1466 = vtanh.f32 %v948_v15  ;;  %v1042_v17 = vadd.f32 %v1183_v14, %v1041_v0 }
 0xe89   :  { %v1421_v18 = vpop.f32.mrf.mxu0 }
 0xe8a   :  { %1468 = vtanh.f32 %v1042_v17 }
 0xe95   :  { %v1467_v20 = vpop.eup %1466 }
 0xe96   :  { %v1046_v21 = vadd.f32 %v1467_v20, %v1465_v19 }
 0xe97   :  { %v1469_v22 = vpop.eup %1468 }
 0xe98   :  { %v1047_v25 = vadd.f32 %v1469_v22, %v1046_v21 }
 0xe9a   :  { %1439 = vmatmul.mubr.msk.f32.vlgmr.msra.gmra.mxu1 %vm594_vm1, %v1047_v25 }
 0xf5a   :  { %v1132_v27 = vpop.f32.mrf.mxu1 }
 0xf5b   :  { %v1133_v28 = vadd.f32 %v1185_v26, %v1132_v27 }
 0xf5c   :  { %v1440_v29 = vpop.f32.mrf.mxu1 }
 0xf5d   :  { %1137 = vst.msk [vmem:[#allocation13] sm:$0xff] %vm1136_vm0, %v1133_v28 }
 0xf5e   :  { %1601 = shalt.err (!%p1598_p6)
}
 0xf5f   :  { %1147 = dma.vmem_to_hbm [thread:$0]  %s1145_s26, 128, %s2125_s18, [#allocation4]  }
 0xf60   :  { %1618 = dma.done.wait [#allocation4], 128  }
 0xf61   :  { %1619 = vsyncadd [#allocation4], 4294967168 }
 0xf62   :  { %1151 = vsyncpa [#allocation3], 1 }
 0xf63   :  { %1152 = vsyncpa [#allocation6], 1 }
 0xf64   :  { %1153 = vsyncpa [#allocation9], 1 }
 0xf65   :  { %1154 = vsyncpa [#allocation12], 1 }
 0xf66   :  { %1155 = vsyncpa [#allocation4], 1 }

</bundles_post_ra>
